<compile_context>
chip_gen: v5e
topology: v5e:2x2
jax: 0.10.0
libtpu: 0.0.40
codegen_flags: <defaults>
</compile_context>

<pallas_src>
import jax
import jax.numpy as jnp
from jax.experimental import pallas as pl
from jax.experimental.pallas import tpu as pltpu


def _make_divisible(v, divisor, min_value=None):
    if min_value is None:
        min_value = divisor
    new_v = max(min_value, int(v + divisor / 2) // divisor * divisor)
    if new_v < 0.9 * v:
        new_v += divisor
    return new_v


# ---------------------------------------------------------------------------
# Kernels
# ---------------------------------------------------------------------------
def _fc_hsigmoid(pool_f32, w1t_ref, b1_ref, w2t_ref, b2_ref):
    """(Bt, C) f32 pooled features -> (Bt, C) f32 squeeze-excite gate."""
    h = jnp.dot(pool_f32, w1t_ref[...],
                preferred_element_type=jnp.float32) + b1_ref[...]   # (Bt, hidden)
    h = jnp.maximum(h, 0.0)                                         # ReLU
    y = jnp.dot(h, w2t_ref[...],
                preferred_element_type=jnp.float32) + b2_ref[...]   # (Bt, C)
    return jnp.clip(y + 3.0, 0.0, 6.0) * (1.0 / 6.0)                # h_sigmoid


def _se_kernel_spatial_last(x_ref, w1t_ref, b1_ref, w2t_ref, b2_ref, o_ref):
    # x block: (Bt, C, HW) in the I/O dtype; HW on lanes.
    x = x_ref[...]
    inv_hw = 1.0 / x.shape[-1]
    # f32 accumulation fused into the lane reduce; no full-tile f32 copy kept live.
    pool = jnp.sum(x, axis=-1, dtype=jnp.float32) * inv_hw           # (Bt, C)
    y = _fc_hsigmoid(pool, w1t_ref, b1_ref, w2t_ref, b2_ref)         # (Bt, C)
    # Scale in the I/O dtype (bf16 VALU on v6e/v7x); only the tiny gate is cast.
    o_ref[...] = x * y.astype(x.dtype)[:, :, None]


def _se_kernel_channels_last(x_ref, w1t_ref, b1_ref, w2t_ref, b2_ref, o_ref):
    # x block: (Bt, HW, C) in the I/O dtype; C on lanes (lane-dense for the
    # 7x7 / 14x14 MobileNetV3 stages where C >= 128 and HW < 128).
    x = x_ref[...]
    inv_hw = 1.0 / x.shape[1]
    pool = jnp.sum(x, axis=1, dtype=jnp.float32) * inv_hw            # (Bt, C)
    y = _fc_hsigmoid(pool, w1t_ref, b1_ref, w2t_ref, b2_ref)         # (Bt, C)
    o_ref[...] = x * y.astype(x.dtype)[:, None, :]


# ---------------------------------------------------------------------------
# Hardware-aware tile planning
# ---------------------------------------------------------------------------
def _tpu_params():
    """(vmem_capacity_bytes, tensorcores_per_chip) with safe fallbacks."""
    vmem_cap = 64 << 20          # conservative default = v7x physical VMEM
    num_cores = 1
    try:
        info = pltpu.get_tpu_info()
        vmem_cap = int(getattr(info, "vmem_capacity_bytes", vmem_cap))
        for name in ("tensorcores_per_chip", "num_tensorcores", "num_cores"):
            v = getattr(info, name, None)
            if v:
                num_cores = int(v)
                break
    except Exception:
        pass
    if num_cores == 1:
        try:
            if "v7" in jax.devices()[0].device_kind.lower():
                num_cores = 2
        except Exception:
            pass
    return vmem_cap, num_cores


def _plan_tiling(B, C, HW, itemsize, hidden):
    """Pick Bt (batch elements per grid step) and the scoped-VMEM limit."""
    vmem_cap, num_cores = _tpu_params()
    weight_bytes = 4 * (2 * C * hidden + hidden + C)      # f32 weights + biases

    def tile_bytes(bt):
        return bt * C * HW * itemsize

    def working_set(bt):
        # in + out x tiles, each double-buffered (4x), ~1 tile of in-kernel
        # temporaries, double-buffered weights, plus slack.
        return 5 * tile_bytes(bt) + 2 * weight_bytes + (1 << 20)

    ws_cap = min(int(0.70 * vmem_cap), 96 << 20)    # ~45 MiB v7x, ~90 MiB v5e/v6e
    tile_cap = 8 << 20                              # diminishing returns past ~8 MiB

    bt = 1
    for cand in range(1, B + 1):
        if (B % cand == 0 and tile_bytes(cand) <= tile_cap
                and working_set(cand) <= ws_cap):
            bt = cand

    # Megacore (v7x): keep the grid length a multiple of the TC count so both
    # cores get balanced work.  On 1-TC chips we never force extra grid steps.
    if num_cores > 1 and B >= num_cores and (B // bt) % num_cores != 0:
        for cand in range(bt, 0, -1):
            if B % cand == 0 and (B // cand) % num_cores == 0:
                bt = cand
                break

    needed = working_set(bt)
    # TODO(synk): if even bt=1 exceeds ws_cap (e.g. C=96 @ 112x112 f32 on v5e),
    # fall back to a two-phase pool-then-scale spatial tiling instead of only
    # raising the limit.
    vmem_limit = int(min(0.85 * vmem_cap, max(needed * 3 // 2, 32 << 20)))
    return bt, vmem_limit


# ---------------------------------------------------------------------------
# Wrappers
# ---------------------------------------------------------------------------
def _se_call(kernel, x3, w1, b1, w2, b2, c_axis):
    B = x3.shape[0]
    C = x3.shape[c_axis]
    HW = x3.shape[3 - c_axis]
    hidden = w1.shape[0]

    # Pre-transpose weights; FC math runs in f32 inside the kernel.
    w1t = jnp.asarray(w1, jnp.float32).T               # (C, hidden)
    w2t = jnp.asarray(w2, jnp.float32).T               # (hidden, C)
    b1r = jnp.asarray(b1, jnp.float32).reshape(1, hidden)
    b2r = jnp.asarray(b2, jnp.float32).reshape(1, C)

    Bt, vmem_limit = _plan_tiling(B, C, HW, jnp.dtype(x3.dtype).itemsize, hidden)
    blk = (Bt,) + x3.shape[1:]

    return pl.pallas_call(
        kernel,
        out_shape=jax.ShapeDtypeStruct(x3.shape, x3.dtype),
        grid_spec=pltpu.PrefetchScalarGridSpec(
            num_scalar_prefetch=0,
            grid=(B // Bt,),
            in_specs=[
                pl.BlockSpec(blk, lambda b: (b, 0, 0)),
                pl.BlockSpec((C, hidden), lambda b: (0, 0)),
                pl.BlockSpec((1, hidden), lambda b: (0, 0)),
                pl.BlockSpec((hidden, C), lambda b: (0, 0)),
                pl.BlockSpec((1, C), lambda b: (0, 0)),
            ],
            out_specs=pl.BlockSpec(blk, lambda b: (b, 0, 0)),
        ),
        compiler_params=pltpu.CompilerParams(
            dimension_semantics=("parallel",),
            vmem_limit_bytes=vmem_limit),
    )(x3, w1t, b1r, w2t, b2r)


def se_layer(x, w1, b1, w2, b2):
    """SELayer forward, NCHW layout.  x: (B, C, H, W) (f32 or bf16);
    w1: (hidden, C), b1: (hidden,), w2: (C, hidden), b2: (C,).
    Returns same shape/dtype as x.

    Note: for small-spatial stages (H*W < 128, C >= 128) the lane axis here is
    sparse; prefer `se_layer_nhwc`, fused with an NHWC producer, instead of
    paying an extra HBM round trip for a wrapper-side transpose."""
    B, C, H, W = x.shape
    out = _se_call(_se_kernel_spatial_last, x.reshape(B, C, H * W),
                   w1, b1, w2, b2, c_axis=1)
    return out.reshape(B, C, H, W)


def se_layer_nhwc(x, w1, b1, w2, b2):
    """SELayer forward, NHWC layout (lane-dense when C >= 128 and H*W small).
    x: (B, H, W, C); weights as in `se_layer`.  Returns (B, H, W, C)."""
    B, H, W, C = x.shape
    out = _se_call(_se_kernel_channels_last, x.reshape(B, H * W, C),
                   w1, b1, w2, b2, c_axis=2)
    return out.reshape(B, H, W, C)


def se_layer_ref(x, w1, b1, w2, b2):
    """Pure-JAX reference mirroring the PyTorch forward (f32 math, NCHW)."""
    xf = x.astype(jnp.float32)
    y = jnp.mean(xf, axis=(2, 3))                       # (B, C)
    y = jnp.maximum(y @ w1.T + b1, 0.0)                 # (B, hidden)
    y = y @ w2.T + b2                                   # (B, C)
    y = jnp.clip(y + 3.0, 0.0, 6.0) / 6.0               # h_sigmoid
    return xf * y[:, :, None, None]


if __name__ == "__main__":
    key = jax.random.PRNGKey(0)

    # ---- Test 1: small NCHW shapes (early-stage-like, H*W lane-dense) ----
    B, C, H, W = 2, 16, 16, 16
    reduction = 4
    hidden = _make_divisible(C // reduction, 8)          # -> 8

    kx, k1, k2, k3, k4, key = jax.random.split(key, 6)
    x = jax.random.normal(kx, (B, C, H, W), dtype=jnp.float32)
    w1 = jax.random.uniform(k1, (hidden, C), jnp.float32, -1.0, 1.0) / jnp.sqrt(C)
    b1 = jax.random.uniform(k2, (hidden,), jnp.float32, -1.0, 1.0) / jnp.sqrt(C)
    w2 = jax.random.uniform(k3, (C, hidden), jnp.float32, -1.0, 1.0) / jnp.sqrt(hidden)
    b2 = jax.random.uniform(k4, (C,), jnp.float32, -1.0, 1.0) / jnp.sqrt(hidden)

    out = jax.block_until_ready(se_layer(x, w1, b1, w2, b2))
    ref = se_layer_ref(x, w1, b1, w2, b2)
    assert out.shape == (B, C, H, W) and out.dtype == jnp.float32
    assert jnp.allclose(out, ref, atol=1e-5, rtol=1e-5), "f32 NCHW mismatch"

    # bf16 I/O path (dtype preserved end-to-end; pool/FC accumulate in f32)
    x_bf16 = x.astype(jnp.bfloat16)
    out_bf16 = jax.block_until_ready(se_layer(x_bf16, w1, b1, w2, b2))
    assert out_bf16.dtype == jnp.bfloat16
    assert jnp.allclose(out_bf16.astype(jnp.float32), ref, atol=5e-2, rtol=5e-2), \
        "bf16 NCHW mismatch"

    # ---- Test 2: channels-last path (late-stage-like: H*W=49 < 128, C=128) ----
    C2, H2, W2 = 128, 7, 7
    hidden2 = _make_divisible(C2 // reduction, 8)        # -> 32
    kx, k1, k2, k3, k4, key = jax.random.split(key, 6)
    x2 = jax.random.normal(kx, (B, C2, H2, W2), dtype=jnp.float32)
    w1_2 = jax.random.uniform(k1, (hidden2, C2), jnp.float32, -1.0, 1.0) / jnp.sqrt(C2)
    b1_2 = jax.random.uniform(k2, (hidden2,), jnp.float32, -1.0, 1.0) / jnp.sqrt(C2)
    w2_2 = jax.random.uniform(k3, (C2, hidden2), jnp.float32, -1.0, 1.0) / jnp.sqrt(hidden2)
    b2_2 = jax.random.uniform(k4, (C2,), jnp.float32, -1.0, 1.0) / jnp.sqrt(hidden2)

    x2_nhwc = jnp.transpose(x2, (0, 2, 3, 1))            # producer-side NHWC
    out2_nhwc = jax.block_until_ready(se_layer_nhwc(x2_nhwc, w1_2, b1_2, w2_2, b2_2))
    ref2 = se_layer_ref(x2, w1_2, b1_2, w2_2, b2_2)
    out2 = jnp.transpose(out2_nhwc, (0, 3, 1, 2))
    assert jnp.allclose(out2, ref2, atol=1e-5, rtol=1e-5), "f32 NHWC mismatch"

    print("KERNEL_OK")
</pallas_src>

<mosaic_0001>
module attributes {stable_mosaic.version = 11 : i64} {
  func.func @_se_kernel_spatial_last(%arg0: i32, %arg1: memref<2x16x256xf32, #tpu.memory_space<vmem>>, %arg2: memref<16x8xf32, #tpu.memory_space<vmem>>, %arg3: memref<1x8xf32, #tpu.memory_space<vmem>>, %arg4: memref<8x16xf32, #tpu.memory_space<vmem>>, %arg5: memref<1x16xf32, #tpu.memory_space<vmem>>, %arg6: memref<2x16x256xf32, #tpu.memory_space<vmem>>) attributes {dimension_semantics = [#tpu.dimension_semantics<parallel>], iteration_bounds = array<i64: 1>, scalar_prefetch = 0 : i64, scratch_operands = 0 : i64, tpu.core_type = #tpu.core_type<tc>, window_params = [{transform_indices = @transform_0, window_bounds = array<i64: 2, 16, 256>}, {pipeline_mode = #tpu.pipeline_mode<synchronous>, transform_indices = @transform_1, window_bounds = array<i64: 16, 8>}, {pipeline_mode = #tpu.pipeline_mode<synchronous>, transform_indices = @transform_2, window_bounds = array<i64: 1, 8>}, {pipeline_mode = #tpu.pipeline_mode<synchronous>, transform_indices = @transform_3, window_bounds = array<i64: 8, 16>}, {pipeline_mode = #tpu.pipeline_mode<synchronous>, transform_indices = @transform_4, window_bounds = array<i64: 1, 16>}, {transform_indices = @transform_5, window_bounds = array<i64: 2, 16, 256>}]} {
    %c0 = arith.constant 0 : index
    %c0_0 = arith.constant 0 : index
    %c0_1 = arith.constant 0 : index
    %0 = vector.load %arg1[%c0, %c0_0, %c0_1] : memref<2x16x256xf32, #tpu.memory_space<vmem>>, vector<2x16x256xf32>
    %cst = arith.constant dense<0.000000e+00> : vector<2x16xf32>
    %1 = vector.multi_reduction <add>, %0, %cst [2] : vector<2x16x256xf32> to vector<2x16xf32>
    %cst_2 = arith.constant 3.906250e-03 : f32
    %2 = vector.broadcast %cst_2 : f32 to vector<2x16xf32>
    %3 = arith.mulf %1, %2 : vector<2x16xf32>
    %c0_3 = arith.constant 0 : index
    %c0_4 = arith.constant 0 : index
    %4 = vector.load %arg2[%c0_3, %c0_4] : memref<16x8xf32, #tpu.memory_space<vmem>>, vector<16x8xf32>
    %cst_5 = arith.constant dense<0.000000e+00> : vector<2x8xf32>
    %5 = tpu.matmul %3, %4, %cst_5 {dimension_numbers = #tpu.dot_dimension_numbers<[1], [0], [0], [1], [0, 0, 1, 1], [], []>} : vector<2x16xf32>, vector<16x8xf32>, vector<2x8xf32> -> vector<2x8xf32>
    %c0_6 = arith.constant 0 : index
    %c0_7 = arith.constant 0 : index
    %6 = vector.load %arg3[%c0_6, %c0_7] : memref<1x8xf32, #tpu.memory_space<vmem>>, vector<1x8xf32>
    %7 = vector.broadcast %6 : vector<1x8xf32> to vector<2x8xf32>
    %8 = arith.addf %5, %7 : vector<2x8xf32>
    %cst_8 = arith.constant 0.000000e+00 : f32
    %9 = vector.broadcast %cst_8 : f32 to vector<2x8xf32>
    %10 = arith.maximumf %8, %9 : vector<2x8xf32>
    %c0_9 = arith.constant 0 : index
    %c0_10 = arith.constant 0 : index
    %11 = vector.load %arg4[%c0_9, %c0_10] : memref<8x16xf32, #tpu.memory_space<vmem>>, vector<8x16xf32>
    %cst_11 = arith.constant dense<0.000000e+00> : vector<2x16xf32>
    %12 = tpu.matmul %10, %11, %cst_11 {dimension_numbers = #tpu.dot_dimension_numbers<[1], [0], [0], [1], [0, 0, 1, 1], [], []>} : vector<2x8xf32>, vector<8x16xf32>, vector<2x16xf32> -> vector<2x16xf32>
    %c0_12 = arith.constant 0 : index
    %c0_13 = arith.constant 0 : index
    %13 = vector.load %arg5[%c0_12, %c0_13] : memref<1x16xf32, #tpu.memory_space<vmem>>, vector<1x16xf32>
    %14 = vector.broadcast %13 : vector<1x16xf32> to vector<2x16xf32>
    %15 = arith.addf %12, %14 : vector<2x16xf32>
    %cst_14 = arith.constant 3.000000e+00 : f32
    %16 = vector.broadcast %cst_14 : f32 to vector<2x16xf32>
    %17 = arith.addf %15, %16 : vector<2x16xf32>
    %cst_15 = arith.constant 0.000000e+00 : f32
    %cst_16 = arith.constant 6.000000e+00 : f32
    %18 = vector.broadcast %cst_15 : f32 to vector<2x16xf32>
    %19 = arith.maximumf %18, %17 : vector<2x16xf32>
    %20 = vector.broadcast %cst_16 : f32 to vector<2x16xf32>
    %21 = arith.minimumf %20, %19 : vector<2x16xf32>
    %cst_17 = arith.constant 0.166666672 : f32
    %22 = vector.broadcast %cst_17 : f32 to vector<2x16xf32>
    %23 = arith.mulf %21, %22 : vector<2x16xf32>
    %24 = vector.shape_cast %23 : vector<2x16xf32> to vector<2x16x1xf32>
    %25 = vector.broadcast %24 : vector<2x16x1xf32> to vector<2x16x256xf32>
    %26 = arith.mulf %0, %25 : vector<2x16x256xf32>
    %c0_18 = arith.constant 0 : index
    %c0_19 = arith.constant 0 : index
    %c0_20 = arith.constant 0 : index
    %27 = vector.load %arg6[%c0_18, %c0_19, %c0_20] : memref<2x16x256xf32, #tpu.memory_space<vmem>>, vector<2x16x256xf32>
    tpu.vector_store %arg6[%c0_18, %c0_19, %c0_20], %26 {strides = array<i32>} : memref<2x16x256xf32, #tpu.memory_space<vmem>>, vector<2x16x256xf32>,
    return
  }
  func.func @transform_0(%arg0: i32) -> (i32, i32, i32) {
    %c0_i32 = arith.constant 0 : i32
    %c0_i32_0 = arith.constant 0 : i32
    %c0_i32_1 = arith.constant 0 : i32
    return %arg0, %c0_i32, %c0_i32_0 : i32, i32, i32
  }
  func.func @transform_1(%arg0: i32) -> (i32, i32) {
    %c0_i32 = arith.constant 0 : i32
    %c0_i32_0 = arith.constant 0 : i32
    %c0_i32_1 = arith.constant 0 : i32
    return %c0_i32, %c0_i32_0 : i32, i32
  }
  func.func @transform_2(%arg0: i32) -> (i32, i32) {
    %c0_i32 = arith.constant 0 : i32
    %c0_i32_0 = arith.constant 0 : i32
    %c0_i32_1 = arith.constant 0 : i32
    return %c0_i32, %c0_i32_0 : i32, i32
  }
  func.func @transform_3(%arg0: i32) -> (i32, i32) {
    %c0_i32 = arith.constant 0 : i32
    %c0_i32_0 = arith.constant 0 : i32
    %c0_i32_1 = arith.constant 0 : i32
    return %c0_i32, %c0_i32_0 : i32, i32
  }
  func.func @transform_4(%arg0: i32) -> (i32, i32) {
    %c0_i32 = arith.constant 0 : i32
    %c0_i32_0 = arith.constant 0 : i32
    %c0_i32_1 = arith.constant 0 : i32
    return %c0_i32, %c0_i32_0 : i32, i32
  }
  func.func @transform_5(%arg0: i32) -> (i32, i32, i32) {
    %c0_i32 = arith.constant 0 : i32
    %c0_i32_0 = arith.constant 0 : i32
    %c0_i32_1 = arith.constant 0 : i32
    return %arg0, %c0_i32, %c0_i32_0 : i32, i32, i32
  }
}

</mosaic_0001>

<bundles_post_ra>
// kernel: tpu_custom_call.1
= control target key start
LH: loop header
LB: loop body
LE: loop exit
PB: predicated region body
PF: predicated region fallthrough
CT: control target
= control target key end

     0   :  { %10 = vsyncpa [#allocation3], 0  ;;  %s359_s0 = inlined_call_operand.hbm [shape: f32[2,16,256], index: 0, kind: input, shape index: {}]   ;;  %s360_s1 = inlined_call_operand.vmem [shape: f32[16,8], index: 1, kind: input, shape index: {}]   ;;  %s361_s2 = inlined_call_operand.vmem [shape: f32[1,8], index: 2, kind: input, shape index: {}]   ;;  %s362_s3 = inlined_call_operand.vmem [shape: f32[8,16], index: 3, kind: input, shape index: {}]   ;;  %s363_s4 = inlined_call_operand.vmem [shape: f32[1,16], index: 4, kind: input, shape index: {}]   ;;  %s364_s5 = inlined_call_operand.hbm [shape: f32[2,16,256], index: 5, kind: output, shape index: {}]  }
   0x1   :  { %11 = vsyncpa [#allocation4], 0  ;;  %s16_s20 = sshll.u32 %s359_s0, 4  ;;  %s266_s21 = smov [#allocation2]   ;;  %s17_s20 = int_to_ptr.hbm [resolvable:$true] %s16_s20 }
   0x2   :  { %s18_s22 = sshll.u32 %s266_s21, 4  ;;  %s267_s23 = smov 256   ;;  %s19_s22 = int_to_ptr.vmem [resolvable:$true] %s18_s22 }
   0x3   :  { %s268_s24 = smov 16  }
   0x4   :  { %24 = dma.hbm_to_vmem [thread:$0]  %s17_s20, 1024, %s19_s22, [#allocation3], %s267_s23, %s267_s23, %s268_s24  }
   0x5   :  { %262 = dma.done.wait [#allocation3], 1024  }
   0x6   :  { %263 = vsyncadd [#allocation3], 4294966272  ;;  %v306_v0 = vld [vmem:[#allocation2 + $0x20] sm:$0xff]  ;;  %v308_v1 = vld [vmem:[#allocation2 + $0x28] sm:$0xff]  ;;  %v71_v15 = vlaneseq  ;;  %vm76_vm0 = vcmask 130112   ;;  %vm81_vm1 = vcmask 1041409  }
   0x7   :  { %v310_v2 = vld [vmem:[#allocation2] sm:$0xff]  ;;  %v51_v3 = vadd.f32 %v308_v1, %v306_v0  ;;  %v314_v4 = vld [vmem:[#allocation2 + $0x8] sm:$0xff]  ;;  %v318_v6 = vld [vmem:[#allocation2 + $0x30] sm:$0xff]  ;;  %vm83_vm2 = vcmask 130048   ;;  %vm112_vm3 = vcmask 64512   ;;  %s188_s9 = sshll.u32 %s364_s5, 4  ;;  %s189_s9 = int_to_ptr.hbm [resolvable:$true] %s188_s9 }
   0x8   :  { %v45_v5 = vadd.f32 %v314_v4, %v310_v2  ;;  %v320_v7 = vld [vmem:[#allocation2 + $0x38] sm:$0xff]  ;;  %v322_v8 = vld [vmem:[#allocation2 + $0x10] sm:$0xff]  ;;  %v62_v12 = vld [vmem:[%s360_s1 + $0x8] sm:$0xff]  ;;  %v72_v17 = vand.u32 127, %v71_v15  ;;  %v142_v37 = vshrl.u32 %v71_v15, 7 }
   0x9   :  { %52 = vadd.xlane.f32.xlu1 %v51_v3  ;;  %v324_v9 = vld [vmem:[#allocation2 + $0x18] sm:$0xff]  ;;  %v54_v10 = vadd.f32 %v320_v7, %v318_v6  ;;  %v61_v13 = vld [vmem:[%s360_s1] sm:$0xff]  ;;  %100 = vmatpush.msra.mxu0 %v62_v12 }
   0xa   :  { %46 = vadd.xlane.f32.xlu0 %v45_v5  ;;  %v48_v11 = vadd.f32 %v324_v9, %v322_v8  ;;  %v74_v19 = vadd.s32 4294967288, %v72_v17  ;;  %v107_v32 = vld [vmem:[%s362_s3] sm:$0xff]  ;;  %207 = vset.pattern.permute.xlu2 %v142_v37  ;;  %v149_v38 = vadd.s32 8, %v142_v37 }
   0xb   :  { %101 = vmatpush.msra.mxu0 %v61_v13  ;;  %131 = vmatpush.msra.mxu1 %v107_v32  ;;  %v212_v33 = vld [vmem:[%s361_s2] ss:$0 sm:$0xff]  ;;  %s269_s2 = smov [#allocation5]  }
   0xc   :  { %209 = vset.pattern.permute.xlu0 %v142_v37  ;;  %210 = vset.pattern.permute.xlu1 %v149_v38  ;;  %v213_v39 = vld [vmem:[%s363_s4] ss:$0 sm:$0xff]  ;;  %s186_s3 = sshll.u32 %s269_s2, 4  ;;  %s187_s3 = int_to_ptr.vmem [resolvable:$true] %s186_s3 }
  0x11   :  { %55 = vadd.xlane.f32.xlu1 %v54_v10 }
  0x12   :  { %49 = vadd.xlane.f32.xlu0 %v48_v11 }
  0x7c   :  { %v53_v14 = vpop.xlane.xlu1 %52 }
  0x7d   :  { %v47_v16 = vpop.xlane.xlu0 %46  ;;  %v59_v18 = vmul.f32 0.00390625, %v53_v14 }
  0x7e   :  { %v57_v20 = vmul.f32 0.00390625, %v47_v16 }
  0x7f   :  { %v78_v25 = vperm.slane %v59_v18, %v72_v17 }
  0x80   :  { %v73_v27 = vperm.slane %v57_v20, %v72_v17 }
  0x84   :  { %v56_v21 = vpop.xlane.xlu1 %55 }
  0x85   :  { %v60_v22 = vmul.f32 0.00390625, %v56_v21  ;;  %v50_v23 = vpop.xlane.xlu0 %49 }
  0x86   :  { %v58_v24 = vmul.f32 0.00390625, %v50_v23 }
  0x87   :  { %v79_v26 = vperm.slane %v60_v22, %v74_v19 }
  0x88   :  { %v75_v28 = vperm.slane %v58_v24, %v74_v19 }
  0x89   :  { %v80_v29 = vsel %vm76_vm0, %v79_v26, %v78_v25 }
  0x8a   :  { %v77_v30 = vsel %vm76_vm0, %v75_v28, %v73_v27 }
  0x8b   :  { %v82_v31 = vsel %vm81_vm1, %v80_v29, %v77_v30 }
  0x8c   :  { %201 = vmatmul.msk.f32.vlgmr.msra.gmra.mxu0 %vm83_vm2, %v82_v31 }
 0x109   :  { %v103_v34 = vpop.f32.mrf.mxu0 }
 0x10a   :  { %v104_v35 = vadd.f32 %v212_v33, %v103_v34 }
 0x10c   :  { %v106_v36 = vmax.f32 %v104_v35, 0.0 }
 0x10e   :  { %202 = vmatmul.msk.f32.vlgmr.msra.gmra.mxu1 %vm112_vm3, %v106_v36 }
 0x18b   :  { %v133_v40 = vpop.f32.mrf.mxu1 }
 0x18c   :  { %v134_v41 = vadd.f32 %v213_v39, %v133_v40 }
 0x18e   :  { %v136_v42 = vadd.f32 3.0, %v134_v41 }
 0x190   :  { %v137_v43 = vmax.f32 %v136_v42, 0.0 }
 0x192   :  { %v138_v44 = vmin.f32 %v137_v43, 6.0 }
 0x194   :  { %v139_v45 = vmul.f32 0.16666667, %v138_v44 }
 0x196   :  { %v153_v46 = vperm.slane %v139_v45, 1  ;;  %v140_v47 = vperm.slane %v139_v45, 0 }
 0x198   :  { %164 = vperm.xlu1 %210, %v153_v46   ;;  %158 = vperm.xlu0 %209, %v153_v46  }
 0x199   :  { %145 = vperm.xlu2 %207, %v140_v47  }
 0x1a0   :  { %211 = vset.pattern.permute.xlu0 %v149_v38 }
 0x1a1   :  { %208 = vset.pattern.permute.xlu2 %v149_v38 }
 0x1a9   :  { %151 = vperm.xlu2 %208, %v140_v47  }
 0x1f3   :  { %v146_v48 = vpop.permute.xlu2 %145 }
 0x1f4   :  { %v166_v49 = vmul.f32 %v146_v48, %v310_v2  ;;  %v167_v50 = vmul.f32 %v146_v48, %v314_v4 }
 0x1f6   :  { %174 = vst [vmem:[#allocation5] sm:$0xff] %v166_v49 }
 0x1f7   :  { %175 = vst [vmem:[#allocation5 + $0x8] sm:$0xff] %v167_v50 }
 0x203   :  { %v152_v51 = vpop.permute.xlu2 %151 }
 0x204   :  { %v168_v52 = vmul.f32 %v152_v51, %v322_v8  ;;  %v169_v53 = vmul.f32 %v152_v51, %v324_v9 }
 0x206   :  { %176 = vst [vmem:[#allocation5 + $0x10] sm:$0xff] %v168_v52 }
 0x207   :  { %177 = vst [vmem:[#allocation5 + $0x18] sm:$0xff] %v169_v53 }
 0x20a   :  { %v165_v54 = vpop.permute.xlu1 %164  ;;  %v159_v55 = vpop.permute.xlu0 %158 }
 0x20b   :  { %v172_v56 = vmul.f32 %v165_v54, %v318_v6  ;;  %v173_v57 = vmul.f32 %v165_v54, %v320_v7  ;;  %v170_v58 = vmul.f32 %v159_v55, %v306_v0  ;;  %v171_v59 = vmul.f32 %v159_v55, %v308_v1 }
 0x20d   :  { %180 = vst [vmem:[#allocation5 + $0x30] sm:$0xff] %v172_v56 }
 0x20e   :  { %181 = vst [vmem:[#allocation5 + $0x38] sm:$0xff] %v173_v57 }
 0x20f   :  { %178 = vst [vmem:[#allocation5 + $0x20] sm:$0xff] %v170_v58 }
 0x210   :  { %179 = vst [vmem:[#allocation5 + $0x28] sm:$0xff] %v171_v59 }
 0x211   :  { %194 = dma.vmem_to_hbm [thread:$0]  %s187_s3, 1024, %s189_s9, [#allocation4], %s267_s23, %s267_s23, %s268_s24  }
 0x212   :  { %264 = dma.done.wait [#allocation4], 1024  }
 0x213   :  { %265 = vsyncadd [#allocation4], 4294966272 }
 0x214   :  { %199 = vsyncpa [#allocation3], 1 }
 0x215   :  { %200 = vsyncpa [#allocation4], 1 }

</bundles_post_ra>
